<compile_context>
chip_gen: v7x
topology: tpu7x:2x2x1
jax: 0.10.0
libtpu: 0.0.40
codegen_flags: <defaults>
</compile_context>

<pallas_src>
import functools
import math

import jax
import jax.numpy as jnp
from jax import lax
from jax.experimental import pallas as pl
from jax.experimental.pallas import tpu as pltpu


def _round_up(x, m):
    return (x + m - 1) // m * m


def _erf(x):
    # erf via the Numerical Recipes erfc rational approximation (|err| < 1.2e-7,
    # float32-level).  The inner divide is an approx EUP reciprocal plus one
    # Newton step (error ~1e-7 rel, same order as the polynomial itself).
    a = jnp.abs(x)
    d = 1.0 + 0.5 * a
    r = pl.reciprocal(d, approx=True)
    r = r * (2.0 - d * r)                       # one Newton-Raphson step
    t = r
    poly = -1.26551223 + t * (1.00002368 + t * (0.37409196 + t * (0.09678418 +
           t * (-0.18628806 + t * (0.27886807 + t * (-1.13520398 + t * (1.48851587 +
           t * (-0.82215223 + t * 0.17087277))))))))
    erfc_a = t * jnp.exp(-a * a + poly)
    erf_a = 1.0 - erfc_a
    return jnp.where(x >= 0.0, erf_a, -erf_a)


def _hl_gauss_ce_kernel(logits_ref, target_ref, out_ref, *,
                        v_min, v_max, sigma, batch):
    """One batch block. logits block is (TB, K); compute is lane-dense (·, TB)."""
    i = pl.program_id(0)

    lg = logits_ref[...].astype(jnp.float32)                          # (TB, K)
    TB, K = lg.shape
    t = jnp.clip(target_ref[...].astype(jnp.float32), v_min, v_max)   # (1, TB)

    # In-kernel transpose to the lane-dense (K, TB) layout via a tiny identity
    # matmul on the idle MXU (A @ B^T form; full-precision so logits are exact).
    eye = (lax.broadcasted_iota(jnp.int32, (K, K), 0) ==
           lax.broadcasted_iota(jnp.int32, (K, K), 1)).astype(jnp.float32)
    logits = lax.dot_general(eye, lg, (((1,), (1,)), ((), ())),
                             precision=lax.Precision.HIGHEST,
                             preferred_element_type=jnp.float32)       # (K, TB)

    inv = 1.0 / (math.sqrt(2.0) * sigma)
    step = (v_max - v_min) / K

    # --- transform_to_probs: shared cdf over the K+1 bin edges ----------------
    j = lax.broadcasted_iota(jnp.int32, (K + 1, 1), 0).astype(jnp.float32)
    edges = v_min + j * step                                           # (K+1, 1)
    cdf = _erf((edges - t) * inv)                                      # (K+1, TB)
    bin_probs = cdf[1:, :] - cdf[:K, :]                                # (K, TB)
    z = cdf[K:, :] - cdf[:1, :]                                        # (1, TB)
    inv_z = 1.0 / (z + 1e-6)                                           # (1, TB)

    # --- soft-target cross entropy: inv_z * (lse * z - sum(bin_probs*logits)) -
    # (sum_k bin_probs telescopes exactly to z, so no separate s_p reduction.)
    m = jnp.max(logits, axis=0, keepdims=True)                         # (1, TB)
    lse = m + jnp.log(jnp.sum(jnp.exp(logits - m), axis=0, keepdims=True))
    s_pl = jnp.sum(bin_probs * logits, axis=0, keepdims=True)          # (1, TB)
    per_col = inv_z * (lse * z - s_pl)                                 # (1, TB)

    # Mask padded / out-of-range batch columns; emit this block's partial sum.
    col = lax.broadcasted_iota(jnp.int32, (1, TB), 1) + i * TB
    per_col = jnp.where(col < batch, per_col, 0.0)
    out_ref[...] = jnp.broadcast_to(jnp.sum(per_col), out_ref.shape)   # (1,8,128)


class HLGaussLossPallas:
    """JAX/Pallas port of HLGuassLoss (forward pass only)."""

    def __init__(self, v_min, v_max, num_bins, sigma, v_expand, v_expand_mode='both'):
        self.v_min = float(v_min)
        self.v_max = float(v_max)
        self.num_bins = int(num_bins)
        self.sigma = float(sigma)
        expand = (v_max - v_min) * v_expand
        if v_expand_mode == 'both':
            self.v_min -= expand / 2
            self.v_max += expand / 2
        elif v_expand_mode == 'min':
            self.v_min -= expand
        elif v_expand_mode == 'max':
            self.v_max += expand
        # Kept for transform_from_probs parity / the pure-JAX reference; the
        # kernel regenerates the edges in-VMEM from an iota.
        self.support = jnp.linspace(self.v_min, self.v_max, self.num_bins + 1,
                                    dtype=jnp.float32)

    def __call__(self, logits, target):
        B, K = logits.shape
        assert K == self.num_bins
        target = jnp.reshape(target, (B,)).astype(jnp.float32)

        # Lane-dense batch tiles (multiple of 128 lanes).  Cap the tile so
        # (a) v7x gets >= 2 grid blocks whenever B >= 256 (two TensorCores),
        # (b) per-step pipeline overhead (~0.35us) is well amortized.
        half = -(-B // 2)
        b_pad = _round_up(B, 128)
        tb = min(2048, max(128, _round_up(half, 128)), b_pad)
        grid = pl.cdiv(b_pad, tb)

        # Only pad when B isn't 128-aligned (cheap insurance; no copy in the
        # common aligned case).  Partial trailing blocks are masked in-kernel.
        if b_pad != B:
            logits = jnp.pad(logits, ((0, b_pad - B), (0, 0)))
            target = jnp.pad(target, (0, b_pad - B))
        target2d = target.reshape(1, b_pad)

        kernel = functools.partial(_hl_gauss_ce_kernel,
                                   v_min=self.v_min, v_max=self.v_max,
                                   sigma=self.sigma, batch=B)

        itemsize = jnp.dtype(logits.dtype).itemsize
        # ~K+1 erfs (exp + recip) per row plus K exps + 1 log for the lse.
        cost = pl.CostEstimate(
            flops=B * (40 * (K + 1) + 12 * K + 2 * K * K),
            transcendentals=B * (2 * (K + 1) + K + 2),
            bytes_accessed=b_pad * K * itemsize + b_pad * 4 + grid * 8 * 128 * 4)

        partials = pl.pallas_call(
            kernel,
            out_shape=jax.ShapeDtypeStruct((grid, 8, 128), jnp.float32),
            grid=(grid,),
            in_specs=[
                pl.BlockSpec((tb, K), lambda i: (i, 0)),    # logits (B_pad, K)
                pl.BlockSpec((1, tb), lambda i: (0, i)),    # target (1, B_pad)
            ],
            out_specs=pl.BlockSpec((1, 8, 128), lambda i: (i, 0, 0)),
            compiler_params=pltpu.CompilerParams(
                dimension_semantics=("parallel",)),
            cost_estimate=cost,
        )(logits, target2d)

        # Every element of a block equals that block's partial sum; full sum /
        # (8*128) recovers sum-over-blocks without a strided gather.
        return jnp.sum(partials) / (8.0 * 128.0 * B)


def _reference_loss(mod, logits, target):
    # Pure-JAX reference mirroring the PyTorch module (uses exact erf).
    t = jnp.clip(jnp.reshape(target, (-1, 1)), mod.v_min, mod.v_max)   # (B,1)
    cdf = jax.scipy.special.erf((mod.support[None, :] - t)
                                / (jnp.sqrt(2.0) * mod.sigma))          # (B,K+1)
    z = cdf[:, -1] - cdf[:, 0]
    bin_probs = cdf[:, 1:] - cdf[:, :-1]
    probs = bin_probs / (z + 1e-6)[:, None]
    log_sm = jax.nn.log_softmax(logits.astype(jnp.float32), axis=-1)
    return jnp.mean(-jnp.sum(probs * log_sm, axis=-1))


if __name__ == "__main__":
    B, num_bins = 8, 32
    v_min, v_max, sigma = -1.0, 1.0, 0.05

    loss_mod = HLGaussLossPallas(v_min, v_max, num_bins, sigma,
                                 v_expand=0.1, v_expand_mode='both')

    key = jax.random.PRNGKey(0)
    k1, k2 = jax.random.split(key)
    logits = jax.random.normal(k1, (B, num_bins), dtype=jnp.float32)
    target = jax.random.uniform(k2, (B, 1), minval=v_min, maxval=v_max,
                                dtype=jnp.float32)

    loss = loss_mod(logits, target)
    jax.block_until_ready(loss)

    ref = _reference_loss(loss_mod, logits, target)
    assert abs(float(loss) - float(ref)) < 1e-3, (float(loss), float(ref))

    print("KERNEL_OK")
</pallas_src>

<mosaic_0001>
module attributes {stable_mosaic.version = 11 : i64} {
  func.func @_hl_gauss_ce_kernel(%arg0: i32, %arg1: memref<128x32xf32, #tpu.memory_space<vmem>>, %arg2: memref<1x128xf32, #tpu.memory_space<vmem>>, %arg3: memref<1x8x128xf32, #tpu.memory_space<vmem>>) attributes {dimension_semantics = [#tpu.dimension_semantics<parallel>], iteration_bounds = array<i64: 1>, scalar_prefetch = 0 : i64, scratch_operands = 0 : i64, tpu.core_type = #tpu.core_type<tc>, window_params = [{transform_indices = @transform_0, window_bounds = array<i64: 128, 32>}, {transform_indices = @transform_1, window_bounds = array<i64: 1, 128>}, {transform_indices = @transform_2, window_bounds = array<i64: 1, 8, 128>}]} {
    %c0 = arith.constant 0 : index
    %c0_0 = arith.constant 0 : index
    %0 = vector.load %arg1[%c0, %c0_0] : memref<128x32xf32, #tpu.memory_space<vmem>>, vector<128x32xf32>
    %c0_1 = arith.constant 0 : index
    %c0_2 = arith.constant 0 : index
    %1 = vector.load %arg2[%c0_1, %c0_2] : memref<1x128xf32, #tpu.memory_space<vmem>>, vector<1x128xf32>
    %cst = arith.constant -1.100000e+00 : f32
    %cst_3 = arith.constant 1.100000e+00 : f32
    %2 = vector.broadcast %cst : f32 to vector<1x128xf32>
    %3 = arith.maximumf %2, %1 : vector<1x128xf32>
    %4 = vector.broadcast %cst_3 : f32 to vector<1x128xf32>
    %5 = arith.minimumf %4, %3 : vector<1x128xf32>
    %6 = tpu.iota {dimensions = array<i32: 0>} : vector<32x32xi32>
    %7 = tpu.iota {dimensions = array<i32: 1>} : vector<32x32xi32>
    %8 = arith.cmpi eq, %6, %7 : vector<32x32xi32>
    %9 = arith.extui %8 : vector<32x32xi1> to vector<32x32xi32>
    %10 = arith.sitofp %9 : vector<32x32xi32> to vector<32x32xf32>
    %cst_4 = arith.constant dense<0.000000e+00> : vector<32x128xf32>
    %11 = tpu.matmul %10, %0, %cst_4 {dimension_numbers = #tpu.dot_dimension_numbers<[1], [1], [0], [0], [0, 0, 1, 0], [], []>, precision = #tpu.contract_precision<fp32>} : vector<32x32xf32>, vector<128x32xf32>, vector<32x128xf32> -> vector<32x128xf32>
    %12 = tpu.iota {dimensions = array<i32: 0>} : vector<33x1xi32>
    %13 = arith.sitofp %12 : vector<33x1xi32> to vector<33x1xf32>
    %cst_5 = arith.constant 6.875000e-02 : f32
    %14 = vector.broadcast %cst_5 : f32 to vector<33x1xf32>
    %15 = arith.mulf %13, %14 : vector<33x1xf32>
    %cst_6 = arith.constant -1.100000e+00 : f32
    %16 = vector.broadcast %cst_6 : f32 to vector<33x1xf32>
    %17 = arith.addf %16, %15 : vector<33x1xf32>
    %18 = vector.broadcast %17 : vector<33x1xf32> to vector<33x128xf32>
    %19 = vector.broadcast %5 : vector<1x128xf32> to vector<33x128xf32>
    %20 = arith.subf %18, %19 : vector<33x128xf32>
    %cst_7 = arith.constant 14.1421356 : f32
    %21 = vector.broadcast %cst_7 : f32 to vector<33x128xf32>
    %22 = arith.mulf %20, %21 : vector<33x128xf32>
    %23 = math.absf %22 : vector<33x128xf32>
    %cst_8 = arith.constant 5.000000e-01 : f32
    %24 = vector.broadcast %cst_8 : f32 to vector<33x128xf32>
    %25 = arith.mulf %24, %23 : vector<33x128xf32>
    %cst_9 = arith.constant 1.000000e+00 : f32
    %26 = vector.broadcast %cst_9 : f32 to vector<33x128xf32>
    %27 = arith.addf %26, %25 : vector<33x128xf32>
    %28 = tpu.reciprocal %27 {approx = true} : vector<33x128xf32> -> vector<33x128xf32>
    %29 = arith.mulf %27, %28 : vector<33x128xf32>
    %cst_10 = arith.constant 2.000000e+00 : f32
    %30 = vector.broadcast %cst_10 : f32 to vector<33x128xf32>
    %31 = arith.subf %30, %29 : vector<33x128xf32>
    %32 = arith.mulf %28, %31 : vector<33x128xf32>
    %cst_11 = arith.constant 0.170872763 : f32
    %33 = vector.broadcast %cst_11 : f32 to vector<33x128xf32>
    %34 = arith.mulf %32, %33 : vector<33x128xf32>
    %cst_12 = arith.constant -0.822152256 : f32
    %35 = vector.broadcast %cst_12 : f32 to vector<33x128xf32>
    %36 = arith.addf %35, %34 : vector<33x128xf32>
    %37 = arith.mulf %32, %36 : vector<33x128xf32>
    %cst_13 = arith.constant 1.48851585 : f32
    %38 = vector.broadcast %cst_13 : f32 to vector<33x128xf32>
    %39 = arith.addf %38, %37 : vector<33x128xf32>
    %40 = arith.mulf %32, %39 : vector<33x128xf32>
    %cst_14 = arith.constant -1.13520396 : f32
    %41 = vector.broadcast %cst_14 : f32 to vector<33x128xf32>
    %42 = arith.addf %41, %40 : vector<33x128xf32>
    %43 = arith.mulf %32, %42 : vector<33x128xf32>
    %cst_15 = arith.constant 0.278868079 : f32
    %44 = vector.broadcast %cst_15 : f32 to vector<33x128xf32>
    %45 = arith.addf %44, %43 : vector<33x128xf32>
    %46 = arith.mulf %32, %45 : vector<33x128xf32>
    %cst_16 = arith.constant -0.186288059 : f32
    %47 = vector.broadcast %cst_16 : f32 to vector<33x128xf32>
    %48 = arith.addf %47, %46 : vector<33x128xf32>
    %49 = arith.mulf %32, %48 : vector<33x128xf32>
    %cst_17 = arith.constant 0.0967841818 : f32
    %50 = vector.broadcast %cst_17 : f32 to vector<33x128xf32>
    %51 = arith.addf %50, %49 : vector<33x128xf32>
    %52 = arith.mulf %32, %51 : vector<33x128xf32>
    %cst_18 = arith.constant 0.374091953 : f32
    %53 = vector.broadcast %cst_18 : f32 to vector<33x128xf32>
    %54 = arith.addf %53, %52 : vector<33x128xf32>
    %55 = arith.mulf %32, %54 : vector<33x128xf32>
    %cst_19 = arith.constant 1.00002372 : f32
    %56 = vector.broadcast %cst_19 : f32 to vector<33x128xf32>
    %57 = arith.addf %56, %55 : vector<33x128xf32>
    %58 = arith.mulf %32, %57 : vector<33x128xf32>
    %cst_20 = arith.constant -1.26551223 : f32
    %59 = vector.broadcast %cst_20 : f32 to vector<33x128xf32>
    %60 = arith.addf %59, %58 : vector<33x128xf32>
    %cst_21 = arith.constant 0.000000e+00 : f32
    %61 = vector.broadcast %cst_21 : f32 to vector<33x128xf32>
    %62 = arith.subf %61, %23 : vector<33x128xf32>
    %63 = arith.mulf %62, %23 : vector<33x128xf32>
    %64 = arith.addf %63, %60 : vector<33x128xf32>
    %65 = math.exp %64 : vector<33x128xf32>
    %66 = arith.mulf %32, %65 : vector<33x128xf32>
    %cst_22 = arith.constant 1.000000e+00 : f32
    %67 = vector.broadcast %cst_22 : f32 to vector<33x128xf32>
    %68 = arith.subf %67, %66 : vector<33x128xf32>
    %cst_23 = arith.constant 0.000000e+00 : f32
    %69 = vector.broadcast %cst_23 : f32 to vector<33x128xf32>
    %70 = arith.cmpf oge, %22, %69 : vector<33x128xf32>
    %cst_24 = arith.constant 0.000000e+00 : f32
    %71 = vector.broadcast %cst_24 : f32 to vector<33x128xf32>
    %72 = arith.subf %71, %68 : vector<33x128xf32>
    %73 = arith.select %70, %68, %72 : vector<33x128xi1>, vector<33x128xf32>
    %74 = vector.extract_strided_slice %73 {offsets = [1, 0], sizes = [32, 128], strides = [1, 1]} : vector<33x128xf32> to vector<32x128xf32>
    %75 = vector.extract_strided_slice %73 {offsets = [0, 0], sizes = [32, 128], strides = [1, 1]} : vector<33x128xf32> to vector<32x128xf32>
    %76 = arith.subf %74, %75 : vector<32x128xf32>
    %77 = vector.extract_strided_slice %73 {offsets = [32, 0], sizes = [1, 128], strides = [1, 1]} : vector<33x128xf32> to vector<1x128xf32>
    %78 = vector.extract_strided_slice %73 {offsets = [0, 0], sizes = [1, 128], strides = [1, 1]} : vector<33x128xf32> to vector<1x128xf32>
    %79 = arith.subf %77, %78 : vector<1x128xf32>
    %cst_25 = arith.constant 9.99999997E-7 : f32
    %80 = vector.broadcast %cst_25 : f32 to vector<1x128xf32>
    %81 = arith.addf %79, %80 : vector<1x128xf32>
    %cst_26 = arith.constant 1.000000e+00 : f32
    %82 = vector.broadcast %cst_26 : f32 to vector<1x128xf32>
    %83 = arith.divf %82, %81 : vector<1x128xf32>
    %cst_27 = arith.constant dense<0xFF800000> : vector<128xf32>
    %84 = vector.multi_reduction <maximumf>, %11, %cst_27 [0] : vector<32x128xf32> to vector<128xf32>
    %85 = vector.shape_cast %84 : vector<128xf32> to vector<1x128xf32>
    %86 = vector.broadcast %85 : vector<1x128xf32> to vector<32x128xf32>
    %87 = arith.subf %11, %86 : vector<32x128xf32>
    %88 = math.exp %87 : vector<32x128xf32>
    %cst_28 = arith.constant dense<0.000000e+00> : vector<128xf32>
    %89 = vector.multi_reduction <add>, %88, %cst_28 [0] : vector<32x128xf32> to vector<128xf32>
    %90 = vector.shape_cast %89 : vector<128xf32> to vector<1x128xf32>
    %91 = math.log %90 : vector<1x128xf32>
    %92 = arith.addf %85, %91 : vector<1x128xf32>
    %93 = arith.mulf %76, %11 : vector<32x128xf32>
    %cst_29 = arith.constant dense<0.000000e+00> : vector<128xf32>
    %94 = vector.multi_reduction <add>, %93, %cst_29 [0] : vector<32x128xf32> to vector<128xf32>
    %95 = vector.shape_cast %94 : vector<128xf32> to vector<1x128xf32>
    %96 = arith.mulf %92, %79 : vector<1x128xf32>
    %97 = arith.subf %96, %95 : vector<1x128xf32>
    %98 = arith.mulf %83, %97 : vector<1x128xf32>
    %99 = tpu.iota {dimensions = array<i32: 1>} : vector<1x128xi32>
    %c128_i32 = arith.constant 128 : i32
    %100 = arith.muli %arg0, %c128_i32 : i32
    %101 = vector.broadcast %100 : i32 to vector<1x128xi32>
    %102 = arith.addi %99, %101 : vector<1x128xi32>
    %c8_i32 = arith.constant 8 : i32
    %103 = vector.broadcast %c8_i32 : i32 to vector<1x128xi32>
    %104 = arith.cmpi slt, %102, %103 : vector<1x128xi32>
    %cst_30 = arith.constant 0.000000e+00 : f32
    %105 = vector.broadcast %cst_30 : f32 to vector<1x128xf32>
    %106 = arith.select %104, %98, %105 : vector<1x128xi1>, vector<1x128xf32>
    %107 = vector.shape_cast %106 : vector<1x128xf32> to vector<1x1x128xf32>
    %cst_31 = arith.constant dense<0.000000e+00> : vector<1xf32>
    %108 = vector.multi_reduction <add>, %107, %cst_31 [1, 2] : vector<1x1x128xf32> to vector<1xf32>
    %109 = vector.shape_cast %108 : vector<1xf32> to vector<1x1x1xf32>
    %110 = vector.extract %109[0, 0, 0] : f32 from vector<1x1x1xf32>
    %111 = vector.broadcast %110 : f32 to vector<1x8x128xf32>
    %c0_32 = arith.constant 0 : index
    %c0_33 = arith.constant 0 : index
    %c0_34 = arith.constant 0 : index
    %112 = vector.load %arg3[%c0_32, %c0_33, %c0_34] : memref<1x8x128xf32, #tpu.memory_space<vmem>>, vector<1x8x128xf32>
    tpu.vector_store %arg3[%c0_32, %c0_33, %c0_34], %111 {strides = array<i32>} : memref<1x8x128xf32, #tpu.memory_space<vmem>>, vector<1x8x128xf32>,
    return
  }
  func.func @transform_0(%arg0: i32) -> (i32, i32) {
    %c0_i32 = arith.constant 0 : i32
    %c0_i32_0 = arith.constant 0 : i32
    return %arg0, %c0_i32 : i32, i32
  }
  func.func @transform_1(%arg0: i32) -> (i32, i32) {
    %c0_i32 = arith.constant 0 : i32
    %c0_i32_0 = arith.constant 0 : i32
    return %c0_i32, %arg0 : i32, i32
  }
  func.func @transform_2(%arg0: i32) -> (i32, i32, i32) {
    %c0_i32 = arith.constant 0 : i32
    %c0_i32_0 = arith.constant 0 : i32
    %c0_i32_1 = arith.constant 0 : i32
    return %arg0, %c0_i32, %c0_i32_0 : i32, i32, i32
  }
}

</mosaic_0001>

<bundles_post_ra>
// kernel: tpu_custom_call.1
= control target key start
LH: loop header
LB: loop body
LE: loop exit
PB: predicated region body
PF: predicated region fallthrough
CT: control target
= control target key end

     0   :  { %vm50_vm0 = vcmask 261120   ;;  %v31_v18 = vlaneseq  ;;  %s2396_s0 = inlined_call_operand.vmem [shape: f32[128,32], index: 0, kind: input, shape index: {}]   ;;  %s2397_s1 = inlined_call_operand.vmem [shape: f32[1,128], index: 1, kind: input, shape index: {}]   ;;  %s2398_s2 = inlined_call_operand.hbm [shape: f32[1,8,128], index: 2, kind: output, shape index: {}]  }
   0x1   :  { %v12_v0 = vld [vmem:[%s2396_s0] sm:$0xff]  ;;  %v13_v1 = vld [vmem:[%s2396_s0 + $0x8] sm:$0xff]  ;;  %v14_v2 = vld [vmem:[%s2396_s0 + $0x10] sm:$0xff] }
   0x2   :  { %v1894_v3 = vsel %vm50_vm0, %v12_v0, 0  ;;  %v1897_v4 = vsel %vm50_vm0, %v13_v1, 0  ;;  %v15_v5 = vld [vmem:[%s2396_s0 + $0x18] sm:$0xff]  ;;  %v1903_v6 = vsel %vm50_vm0, %v14_v2, 0  ;;  %v16_v11 = vld [vmem:[%s2396_s0 + $0x20] sm:$0xff]  ;;  %v17_v12 = vld [vmem:[%s2396_s0 + $0x28] sm:$0xff] }
   0x3   :  { %v112_v7 = vand.u32 4294901760, %v1894_v3  ;;  %v115_v8 = vand.u32 4294901760, %v1897_v4  ;;  %v1908_v9 = vsel %vm50_vm0, %v15_v5, 0  ;;  %v118_v10 = vand.u32 4294901760, %v1903_v6 }
   0x4   :  { %v121_v13 = vand.u32 4294901760, %v1908_v9  ;;  %v1931_v16 = vsel %vm50_vm0, %v16_v11, 0  ;;  %v1934_v17 = vsel %vm50_vm0, %v17_v12, 0 }
   0x5   :  { %v1922_v14 = vpack.c.bf16 %v115_v8, %v112_v7 }
   0x6   :  { %v1928_v15 = vpack.c.bf16 %v121_v13, %v118_v10 }
   0x7   :  { %1596 = vmatprep.subr.bf16.mxu1 %v1922_v14  ;;  %1692 = vmatprep.subr.bf16.mxu0 %v1922_v14 }
   0x8   :  { %7 = vsyncpa [#allocation3], 0  ;;  %1598 = vmatpush3.bf16.xpose.msra.mxu1 %v1922_v14  ;;  %1694 = vmatpush3.bf16.xpose.msra.mxu0 %v1922_v14  ;;  %v124_v19 = vand.u32 4294901760, %v1931_v16  ;;  %v127_v20 = vand.u32 4294901760, %v1934_v17  ;;  %v18_v21 = vld [vmem:[%s2396_s0 + $0x30] sm:$0xff]  ;;  %v19_v22 = vld [vmem:[%s2396_s0 + $0x38] sm:$0xff]  ;;  %v2007_v52 = vsub.f32 %v1894_v3, %v112_v7  ;;  %v2012_v53 = vsub.f32 %v1897_v4, %v115_v8 }
   0x9   :  { %1600 = vmatprep.subr.bf16.mxu1 %v1928_v15  ;;  %1696 = vmatprep.subr.bf16.mxu0 %v1928_v15  ;;  %v1950_v23 = vshrl.u32 %v31_v18, 7  ;;  %v1952_v24 = vand.u32 127, %v31_v18  ;;  %v82_v26 = vsel %vm50_vm0, %v18_v21, 0  ;;  %v85_v27 = vsel %vm50_vm0, %v19_v22, 0  ;;  %v20_v34 = vld [vmem:[%s2396_s0 + $0x40] sm:$0xff]  ;;  %v21_v35 = vld [vmem:[%s2396_s0 + $0x48] sm:$0xff] }
   0xa   :  { %v1954_v25 = vpack.c.bf16 %v127_v20, %v124_v19  ;;  %v1867_v28 = vmov 0.0   ;;  %v130_v31 = vand.u32 4294901760, %v82_v26  ;;  %v133_v32 = vand.u32 4294901760, %v85_v27  ;;  %v22_v44 = vld [vmem:[%s2396_s0 + $0x50] sm:$0xff]  ;;  %v23_v45 = vld [vmem:[%s2396_s0 + $0x58] sm:$0xff]  ;;  %v24_v51 = vld [vmem:[%s2396_s0 + $0x60] sm:$0xff] }
   0xb   :  { %2400 = vst [vmem:[#allocation5_spill] sm:$0xff] %v1952_v24  ;;  %vm38_vm1 = vcmp.eq.s32.totalorder %v1950_v23, %v1952_v24  ;;  %v88_v39 = vsel %vm50_vm0, %v20_v34, 0  ;;  %v91_v40 = vsel %vm50_vm0, %v21_v35, 0  ;;  %v94_v47 = vsel %vm50_vm0, %v22_v44, 0  ;;  %v25_v54 = vld [vmem:[%s2396_s0 + $0x68] sm:$0xff] }
   0xc   :  { %v1961_v29 = vsel %vm38_vm1, 1.0, %v1867_v28  ;;  %v1978_v37 = vpack.c.bf16 %v133_v32, %v130_v31  ;;  %v136_v42 = vand.u32 4294901760, %v88_v39  ;;  %v139_v43 = vand.u32 4294901760, %v91_v40 }
   0xd   :  { %v52_v30 = vsel %vm50_vm0, %v1961_v29, 0  ;;  %v97_v48 = vsel %vm50_vm0, %v23_v45, 0  ;;  %v142_v49 = vand.u32 4294901760, %v94_v47  ;;  %v2019_v55 = vpack.c.bf16 %v2012_v53, %v2007_v52 }
   0xe   :  { %v1969_v33 = vsub.f32 %v52_v30, %v52_v30  ;;  %v1993_v46 = vpack.c.bf16 %v139_v43, %v136_v42  ;;  %v145_v50 = vand.u32 4294901760, %v97_v48  ;;  %v100_v57 = vsel %vm50_vm0, %v24_v51, 0 }
   0xf   :  { %v103_v58 = vsel %vm50_vm0, %v25_v54, 0  ;;  %v2028_v59 = vsub.f32 %v1903_v6, %v118_v10  ;;  %v2033_v60 = vsub.f32 %v1908_v9, %v121_v13  ;;  %v2036_v61 = vsub.f32 %v1931_v16, %v124_v19  ;;  %v26_v9 = vld [vmem:[%s2396_s0 + $0x70] sm:$0xff]  ;;  %v27_v10 = vld [vmem:[%s2396_s0 + $0x78] sm:$0xff] }
  0x10   :  { %1602 = vmatpush3.bf16.xpose.msra.mxu1 %v1928_v15  ;;  %1698 = vmatpush3.bf16.xpose.msra.mxu0 %v1928_v15  ;;  %v194_v36 = vand.u32 4294901760, %v1969_v33  ;;  %v2021_v56 = vpack.c.bf16 %v145_v50, %v142_v49  ;;  %v2039_v62 = vsub.f32 %v1934_v17, %v127_v20  ;;  %v2041_v63 = vsub.f32 %v82_v26, %v130_v31 }
  0x11   :  { %1604 = vmatprep.subr.bf16.mxu1 %v1954_v25  ;;  %1700 = vmatprep.subr.bf16.mxu0 %v1954_v25  ;;  %v2043_v0 = vsub.f32 %v85_v27, %v133_v32  ;;  %v148_v1 = vand.u32 4294901760, %v100_v57  ;;  %v2047_v2 = vsub.f32 %v88_v39, %v136_v42  ;;  %v2049_v3 = vsub.f32 %v91_v40, %v139_v43 }
  0x12   :  { %v195_v38 = vsub.f32 %v1969_v33, %v194_v36  ;;  %1513 = vmatprep.mubr.f32.mxu0 %v194_v36  ;;  %v2051_v4 = vsub.f32 %v94_v47, %v142_v49  ;;  %v151_v5 = vand.u32 4294901760, %v103_v58  ;;  %v2055_v6 = vsub.f32 %v97_v48, %v145_v50 }
  0x13   :  { %v2059_v7 = vpack.c.bf16 %v2033_v60, %v2028_v59  ;;  %v2063_v8 = vpack.c.bf16 %v2039_v62, %v2036_v61  ;;  %v2072_v11 = vadd.s32 8, %v1950_v23  ;;  %v2076_v12 = vpack.c.bf16 %v2043_v0, %v2041_v63 }
  0x14   :  { %v196_v41 = vand.u32 4294901760, %v195_v38  ;;  %v2080_v13 = vpack.c.bf16 %v2049_v3, %v2047_v2  ;;  %v2084_v16 = vpack.c.bf16 %v2055_v6, %v2051_v4  ;;  %v2086_v17 = vpack.c.bf16 %v151_v5, %v148_v1 }
  0x15   :  { %v106_v18 = vsel %vm50_vm0, %v26_v9, 0  ;;  %v109_v19 = vsel %vm50_vm0, %v27_v10, 0  ;;  %v2091_v20 = vadd.s32 16, %v1950_v23  ;;  %vm39_vm2 = vcmp.eq.s32.totalorder %v2072_v11, %v1952_v24 }
  0x16   :  { %1399 = vmatprep.mubr.f32.mxu1 %v196_v41  ;;  %v2095_v21 = vsub.f32 %v100_v57, %v148_v1  ;;  %v2097_v22 = vsub.f32 %v103_v58, %v151_v5  ;;  %v2100_v26 = vadd.s32 24, %v1950_v23  ;;  %v154_v27 = vand.u32 4294901760, %v106_v18 }
  0x17   :  { %v157_v30 = vand.u32 4294901760, %v109_v19  ;;  %v235_v32 = vand.u32 4294901760, %v2007_v52  ;;  %v242_v34 = vand.u32 4294901760, %v2012_v53  ;;  %v2113_v35 = vsel %vm39_vm2, 1.0, %v1867_v28 }
  0x18   :  { %1606 = vmatpush3.bf16.xpose.msra.mxu1 %v1954_v25  ;;  %1702 = vmatpush3.bf16.xpose.msra.mxu0 %v1954_v25  ;;  %v2106_v31 = vpack.c.bf16 %v2097_v22, %v2095_v21  ;;  %vm40_vm3 = vcmp.eq.s32.totalorder %v2091_v20, %v1952_v24  ;;  %vm41_vm4 = vcmp.eq.s32.totalorder %v2100_v26, %v1952_v24  ;;  %v55_v36 = vsel %vm50_vm0, %v2113_v35, 0 }
  0x19   :  { %1608 = vmatprep.subr.bf16.mxu1 %v1978_v37  ;;  %1704 = vmatprep.subr.bf16.mxu0 %v1978_v37  ;;  %v2122_v38 = vsel %vm40_vm3, 1.0, %v1867_v28  ;;  %v2124_v39 = vpack.c.bf16 %v157_v30, %v154_v27  ;;  %v236_v40 = vsub.f32 %v2007_v52, %v235_v32  ;;  %v243_v41 = vsub.f32 %v2012_v53, %v242_v34 }
  0x1a   :  { %v2129_v42 = vsel %vm41_vm4, 1.0, %v1867_v28  ;;  %v2131_v43 = vsub.f32 %v106_v18, %v154_v27  ;;  %v2133_v44 = vsub.f32 %v109_v19, %v157_v30  ;;  %v2135_v45 = vsub.f32 %v55_v36, %v55_v36 }
  0x1b   :  { %v58_v47 = vsel %vm50_vm0, %v2122_v38, 0  ;;  %v61_v48 = vsel %vm50_vm0, %v2129_v42, 0  ;;  %v237_v49 = vand.u32 4294901760, %v236_v40  ;;  %v244_v50 = vand.u32 4294901760, %v243_v41 }
  0x1c   :  { %v2145_v28 = vpack.c.bf16 %v2133_v44, %v2131_v43  ;;  %v249_v51 = vand.u32 4294901760, %v2028_v59  ;;  %v256_v52 = vand.u32 4294901760, %v2033_v60  ;;  %v2151_v53 = vsub.f32 %v58_v47, %v58_v47 }
  0x1d   :  { %v204_v54 = vand.u32 4294901760, %v2135_v45  ;;  %v2154_v57 = vsub.f32 %v61_v48, %v61_v48  ;;  %v1627_v58 = vpack.c.bf16 %v244_v50, %v237_v49  ;;  %v1723_v1 = vpack.c.bf16 %v242_v34, %v235_v32 }
  0x1e   :  { %v250_v5 = vsub.f32 %v2028_v59, %v249_v51  ;;  %v257_v9 = vsub.f32 %v2033_v60, %v256_v52  ;;  %v214_v10 = vand.u32 4294901760, %v2151_v53  ;;  %v263_v32 = vand.u32 4294901760, %v2036_v61 }
  0x1f   :  { %v205_v18 = vsub.f32 %v2135_v45, %v204_v54  ;;  %v224_v19 = vand.u32 4294901760, %v2154_v57  ;;  %v270_v59 = vand.u32 4294901760, %v2039_v62  ;;  %v1727_v41 = vpack.c.bf16 %v256_v52, %v249_v51 }
  0x20   :  { %1610 = vmatpush3.bf16.xpose.msra.mxu1 %v1978_v37  ;;  %1706 = vmatpush3.bf16.xpose.msra.mxu0 %v1978_v37  ;;  %v251_v27 = vand.u32 4294901760, %v250_v5  ;;  %v258_v30 = vand.u32 4294901760, %v257_v9  ;;  %v215_v60 = vsub.f32 %v2151_v53, %v214_v10  ;;  %v264_v47 = vsub.f32 %v2036_v61, %v263_v32 }
  0x21   :  { %1612 = vmatprep.subr.bf16.mxu1 %v1993_v46  ;;  %1708 = vmatprep.subr.bf16.mxu0 %v1993_v46  ;;  %v206_v34 = vand.u32 4294901760, %v205_v18  ;;  %v225_v36 = vsub.f32 %v2154_v57, %v224_v19  ;;  %v271_v48 = vsub.f32 %v2039_v62, %v270_v59  ;;  %v277_v18 = vand.u32 4294901760, %v2041_v63 }
  0x22   :  { %v1631_v40 = vpack.c.bf16 %v258_v30, %v251_v27  ;;  %v216_v49 = vand.u32 4294901760, %v215_v60  ;;  %v265_v5 = vand.u32 4294901760, %v264_v47  ;;  %v284_v24 = vand.u32 4294901760, %v2043_v0 }
  0x23   :  { %v226_v50 = vand.u32 4294901760, %v225_v36  ;;  %v272_v9 = vand.u32 4294901760, %v271_v48  ;;  %v1731_v62 = vpack.c.bf16 %v270_v59, %v263_v32  ;;  %v278_v51 = vsub.f32 %v2041_v63, %v277_v18 }
  0x24   :  { %v285_v52 = vsub.f32 %v2043_v0, %v284_v24  ;;  %v1735_v27 = vpack.c.bf16 %v284_v24, %v277_v18  ;;  %v305_v59 = vand.u32 4294901760, %v2051_v4  ;;  %v312_v60 = vand.u32 4294901760, %v2055_v6 }
  0x25   :  { %v1635_v61 = vpack.c.bf16 %v272_v9, %v265_v5  ;;  %v326_v47 = vand.u32 4294901760, %v2097_v22  ;;  %v333_v9 = vand.u32 4294901760, %v2131_v43  ;;  %v340_v18 = vand.u32 4294901760, %v2133_v44 }
  0x26   :  { %v313_v24 = vsub.f32 %v2055_v6, %v312_v60  ;;  %vm1092_vm9 = vcmask 1040384   ;;  %vm1173_vm11 = vcmask 1046528  }
  0x27   :  { %v327_v5 = vsub.f32 %v2097_v22, %v326_v47 }
  0x28   :  { %1614 = vmatpush3.bf16.xpose.msra.mxu1 %v1993_v46  ;;  %1710 = vmatpush3.bf16.xpose.msra.mxu0 %v1993_v46 }
  0x29   :  { %1616 = vmatprep.subr.bf16.mxu1 %v2021_v56  ;;  %1712 = vmatprep.subr.bf16.mxu0 %v2021_v56  ;;  %v328_v6 = vand.u32 4294901760, %v327_v5 }
  0x30   :  { %1618 = vmatpush3.bf16.xpose.msra.mxu1 %v2021_v56  ;;  %1714 = vmatpush3.bf16.xpose.msra.mxu0 %v2021_v56 }
  0x31   :  { %1620 = vmatprep.subr.bf16.mxu1 %v2086_v17  ;;  %1716 = vmatprep.subr.bf16.mxu0 %v2086_v17 }
  0x38   :  { %1622 = vmatpush3.bf16.xpose.msra.mxu1 %v2086_v17  ;;  %1718 = vmatpush3.bf16.xpose.msra.mxu0 %v2086_v17 }
  0x39   :  { %1624 = vmatprep.subr.bf16.mxu1 %v2124_v39  ;;  %1720 = vmatprep.subr.bf16.mxu0 %v2124_v39 }
  0x40   :  { %1626 = vmatpush3.bf16.xpose.msra.mxu1 %v2124_v39  ;;  %1722 = vmatpush3.bf16.xpose.msra.mxu0 %v2124_v39 }
  0x41   :  { %1628 = vmatprep.subr.bf16.mxu1 %v1627_v58  ;;  %1724 = vmatprep.subr.bf16.mxu0 %v1723_v1 }
  0x47   :  { %1400 = vmatmul.mubr.f32.vlgmr.msra.gmra.mrb[0].mxu1 %v206_v34  ;;  %1514 = vmatmul.mubr.f32.vlgmr.msra.gmra.mrb[0].mxu0 %v204_v54  ;;  %v279_v54 = vand.u32 4294901760, %v278_v51  ;;  %v334_v51 = vsub.f32 %v2131_v43, %v333_v9 }
  0x48   :  { %1630 = vmatpush3.bf16.xpose.msra.mxu1 %v1627_v58  ;;  %1726 = vmatpush3.bf16.xpose.msra.mxu0 %v1723_v1  ;;  %v286_v58 = vand.u32 4294901760, %v285_v52  ;;  %v291_v1 = vand.u32 4294901760, %v2047_v2  ;;  %v341_v52 = vsub.f32 %v2133_v44, %v340_v18 }
  0x49   :  { %1632 = vmatprep.subr.bf16.mxu1 %v1631_v40  ;;  %1728 = vmatprep.subr.bf16.mxu0 %v1727_v41 }
  0x4a   :  { %1402 = vmatprep.mubr.f32.mxu1 %v216_v49  ;;  %1516 = vmatprep.mubr.f32.mxu0 %v214_v10  ;;  %v298_v10 = vand.u32 4294901760, %v2049_v3  ;;  %v292_v30 = vsub.f32 %v2047_v2, %v291_v1  ;;  %v1743_v49 = vpack.c.bf16 %v312_v60, %v305_v59  ;;  %v342_v22 = vand.u32 4294901760, %v341_v52 }
  0x4b   :  { %1403 = vmatmul.mubr.f32.gmra.mrb[2].mxu1 %v226_v50  ;;  %1517 = vmatmul.mubr.f32.gmra.mrb[2].mxu0 %v224_v19  ;;  %v1639_v19 = vpack.c.bf16 %v286_v58, %v279_v54  ;;  %v1751_v58 = vpack.c.bf16 %v340_v18, %v333_v9 }
  0x4c   :  { %1437 = vmatprep.mubr.msk.f32.mxu1 %vm50_vm0, %v1961_v29  ;;  %1551 = vmatprep.mubr.msk.f32.mxu0 %vm50_vm0, %v1961_v29  ;;  %v299_v32 = vsub.f32 %v2049_v3, %v298_v10  ;;  %v293_v63 = vand.u32 4294901760, %v292_v30  ;;  %v1739_v36 = vpack.c.bf16 %v298_v10, %v291_v1  ;;  %v314_v3 = vand.u32 4294901760, %v313_v24 }
  0x4e   :  { %v300_v0 = vand.u32 4294901760, %v299_v32 }
  0x50   :  { %1634 = vmatpush3.bf16.xpose.msra.mxu1 %v1631_v40  ;;  %1730 = vmatpush3.bf16.xpose.msra.mxu0 %v1727_v41  ;;  %v1643_v34 = vpack.c.bf16 %v300_v0, %v293_v63  ;;  %v306_v40 = vsub.f32 %v2051_v4, %v305_v59  ;;  %v319_v41 = vand.u32 4294901760, %v2095_v21 }
  0x51   :  { %1636 = vmatprep.subr.bf16.mxu1 %v1635_v61  ;;  %1732 = vmatprep.subr.bf16.mxu0 %v1731_v62 }
  0x52   :  { %v307_v2 = vand.u32 4294901760, %v306_v40  ;;  %v320_v50 = vsub.f32 %v2095_v21, %v319_v41  ;;  %v335_v21 = vand.u32 4294901760, %v334_v51 }
  0x54   :  { %v1647_v48 = vpack.c.bf16 %v314_v3, %v307_v2  ;;  %v321_v4 = vand.u32 4294901760, %v320_v50  ;;  %v1655_v54 = vpack.c.bf16 %v342_v22, %v335_v21 }
  0x58   :  { %1638 = vmatpush3.bf16.xpose.msra.mxu1 %v1635_v61  ;;  %1734 = vmatpush3.bf16.xpose.msra.mxu0 %v1731_v62  ;;  %v1651_v61 = vpack.c.bf16 %v328_v6, %v321_v4  ;;  %v1747_v62 = vpack.c.bf16 %v326_v47, %v319_v41 }
  0x59   :  { %1640 = vmatprep.subr.bf16.mxu1 %v1639_v19  ;;  %1736 = vmatprep.subr.bf16.mxu0 %v1735_v27 }
  0x60   :  { %1642 = vmatpush3.bf16.xpose.msra.mxu1 %v1639_v19  ;;  %1738 = vmatpush3.bf16.xpose.msra.mxu0 %v1735_v27 }
  0x61   :  { %1644 = vmatprep.subr.bf16.mxu1 %v1643_v34  ;;  %1740 = vmatprep.subr.bf16.mxu0 %v1739_v36 }
  0x68   :  { %1646 = vmatpush3.bf16.xpose.msra.mxu1 %v1643_v34  ;;  %1742 = vmatpush3.bf16.xpose.msra.mxu0 %v1739_v36 }
  0x69   :  { %1648 = vmatprep.subr.bf16.mxu1 %v1647_v48  ;;  %1744 = vmatprep.subr.bf16.mxu0 %v1743_v49 }
  0x70   :  { %1650 = vmatpush3.bf16.xpose.msra.mxu1 %v1647_v48  ;;  %1746 = vmatpush3.bf16.xpose.msra.mxu0 %v1743_v49 }
  0x71   :  { %1652 = vmatprep.subr.bf16.mxu1 %v1651_v61  ;;  %1748 = vmatprep.subr.bf16.mxu0 %v1747_v62 }
  0x78   :  { %1654 = vmatpush3.bf16.xpose.msra.mxu1 %v1651_v61  ;;  %1750 = vmatpush3.bf16.xpose.msra.mxu0 %v1747_v62 }
  0x79   :  { %1656 = vmatprep.subr.bf16.mxu1 %v1655_v54  ;;  %1752 = vmatprep.subr.bf16.mxu0 %v1751_v58 }
  0x80   :  { %1658 = vmatpush3.bf16.xpose.msra.mxu1 %v1655_v54  ;;  %1754 = vmatpush3.bf16.xpose.msra.mxu0 %v1751_v58 }
  0x81   :  { %1660 = vmatprep.subr.bf16.mxu1 %v2019_v55  ;;  %1756 = vmatprep.subr.bf16.mxu0 %v1922_v14 }
  0x87   :  { %1438 = vmatmul.mubr.msk.f32.vlgmr.msra.gmra.mrb[0].mxu1 %vm50_vm0, %v2113_v35  ;;  %1552 = vmatmul.mubr.msk.f32.vlgmr.msra.gmra.mrb[0].mxu0 %vm50_vm0, %v2113_v35 }
  0x88   :  { %1662 = vmatpush3.bf16.xpose.msra.mxu1 %v2019_v55  ;;  %1758 = vmatpush3.bf16.xpose.msra.mxu0 %v1922_v14  ;;  %v882_v14 = vcvt.s32.f32 %v1950_v23 }
  0x89   :  { %1664 = vmatprep.subr.bf16.mxu1 %v2059_v7  ;;  %1760 = vmatprep.subr.bf16.mxu0 %v1928_v15 }
  0x8a   :  { %1440 = vmatprep.mubr.msk.f32.mxu1 %vm50_vm0, %v2122_v38  ;;  %1554 = vmatprep.mubr.msk.f32.mxu0 %vm50_vm0, %v2122_v38 }
  0x8b   :  { %1441 = vmatmul.mubr.msk.f32.gmra.mrb[2].mxu1 %vm50_vm0, %v2129_v42  ;;  %1555 = vmatmul.mubr.msk.f32.gmra.mrb[2].mxu0 %vm50_vm0, %v2129_v42 }
  0x8c   :  { %1475 = vmatprep.mubr.f32.mxu1 %v1969_v33  ;;  %1589 = vmatprep.mubr.msk.f32.mxu0 %vm50_vm0, %v1961_v29  ;;  %v885_v29 = vcvt.s32.f32 %v2100_v26 }
  0x90   :  { %1666 = vmatpush3.bf16.xpose.msra.mxu1 %v2059_v7  ;;  %1762 = vmatpush3.bf16.xpose.msra.mxu0 %v1928_v15  ;;  %v883_v15 = vcvt.s32.f32 %v2072_v11  ;;  %v881_v7 = vadd.s32 32, %v1950_v23 }
  0x91   :  { %1668 = vmatprep.subr.bf16.mxu1 %v2063_v8  ;;  %1764 = vmatprep.subr.bf16.mxu0 %v1954_v25 }
  0x92   :  { %v888_v55 = vmul.f32 0.06875, %v883_v15 }
  0x98   :  { %1670 = vmatpush3.bf16.xpose.msra.mxu1 %v2063_v8  ;;  %1766 = vmatpush3.bf16.xpose.msra.mxu0 %v1954_v25  ;;  %v28_v25 = vld [vmem:[%s2397_s1] sm:$0x1]  ;;  %v890_v8 = vmul.f32 0.06875, %v885_v29  ;;  %s1868_s1 = smov [#allocation2]  }
  0x99   :  { %1672 = vmatprep.subr.bf16.mxu1 %v2076_v12  ;;  %1768 = vmatprep.subr.bf16.mxu0 %v1978_v37  ;;  %v1230_v33 = vclamps-f32 %v28_v25, 1.1  ;;  %s1222_s14 = sshll.u32 %s1868_s1, 4  ;;  %s1223_s14 = int_to_ptr.vmem [resolvable:$true] %s1222_s14 }
  0x9a   :  { %s1843_s16 = scalar_lea.vmem %s1223_s14, 128  ;;  %p1848_p1 = scmp.lt.s32.totalorder %s1223_s14, %s1223_s14 }
  0x9b   :  { %p1844_p0 = scmp.ne.s32.totalorder %s1223_s14, %s1843_s16  ;;  %p1849_p2 = scmp.lt.s32.totalorder %s1843_s16, %s1843_s16 }
  0x9d   :  { %p1850_p3 = por %p1849_p2, %p1848_p1 }
  0x9f   :  { %p1851_p4 = pnand %p1850_p3, %p1844_p0 }
  0xa0   :  { %1674 = vmatpush3.bf16.xpose.msra.mxu1 %v2076_v12  ;;  %1770 = vmatpush3.bf16.xpose.msra.mxu0 %v1978_v37  ;;  %v887_v37 = vmul.f32 0.06875, %v882_v14 }
  0xa1   :  { %1676 = vmatprep.subr.bf16.mxu1 %v2080_v13  ;;  %1772 = vmatprep.subr.bf16.mxu0 %v1993_v46 }
  0xa2   :  { %v892_v12 = vadd.f32 -1.1, %v887_v37 }
  0xa8   :  { %1678 = vmatpush3.bf16.xpose.msra.mxu1 %v2080_v13  ;;  %1774 = vmatpush3.bf16.xpose.msra.mxu0 %v1993_v46  ;;  %v900_v46 = vsub.s32 0, %v1950_v23 }
  0xa9   :  { %1680 = vmatprep.subr.bf16.mxu1 %v2084_v16  ;;  %1776 = vmatprep.subr.bf16.mxu0 %v2021_v56 }
  0xaa   :  { %v901_v13 = vrot.slane %v1230_v33, %v900_v46 }
  0xb0   :  { %1682 = vmatpush3.bf16.xpose.msra.mxu1 %v2084_v16  ;;  %1778 = vmatpush3.bf16.xpose.msra.mxu0 %v2021_v56  ;;  %v884_v56 = vcvt.s32.f32 %v2091_v20  ;;  %v893_v16 = vadd.f32 -1.1, %v888_v55 }
  0xb1   :  { %1684 = vmatprep.subr.bf16.mxu1 %v2106_v31  ;;  %1780 = vmatprep.subr.bf16.mxu0 %v2086_v17 }
  0xb2   :  { %v889_v11 = vmul.f32 0.06875, %v884_v56 }
  0xb8   :  { %1686 = vmatpush3.bf16.xpose.msra.mxu1 %v2106_v31  ;;  %1782 = vmatpush3.bf16.xpose.msra.mxu0 %v2086_v17  ;;  %v886_v17 = vcvt.s32.f32 %v881_v7  ;;  %v903_v31 = vsub.f32 %v892_v12, %v901_v13 }
  0xb9   :  { %1688 = vmatprep.subr.bf16.mxu1 %v2145_v28  ;;  %1784 = vmatprep.subr.bf16.mxu0 %v2124_v39 }
  0xba   :  { %v891_v26 = vmul.f32 0.06875, %v886_v17 }
  0xbc   :  { %v896_v20 = vadd.f32 -1.1, %v891_v26 }
  0xbe   :  { %v907_v1 = vsub.f32 %v896_v20, %v901_v13 }
  0xc0   :  { %1690 = vmatpush3.bf16.xpose.msra.mxu1 %v2145_v28  ;;  %1786 = vmatpush3.bf16.xpose.msra.mxu0 %v2124_v39  ;;  %v904_v39 = vsub.f32 %v893_v16, %v901_v13  ;;  %v2280_v32 = vmul.f32 14.142136, %v907_v1 }
  0xc2   :  { %v2260_v44 = vmul.f32 14.142136, %v904_v39  ;;  %v2285_v34 = vand.u32 2147483647, %v2280_v32  ;;  %vm1077_vm10 = vcmp.ge.f32.partialorder %v2280_v32, 0.0 }
  0xc4   :  { %v922_v24 = vmul.f32 0.5, %v2285_v34  ;;  %vm1074_vm6 = vcmp.ge.f32.partialorder %v2260_v44, 0.0 }
  0xc6   :  { %v927_v2 = vadd.f32 1.0, %v922_v24 }
  0xc7   :  { %1476 = vmatmul.mubr.f32.vlgmr.msra.gmra.mrb[0].mxu1 %v2135_v45  ;;  %1590 = vmatmul.mubr.msk.f32.vlgmr.msra.gmra.mrb[0].mxu0 %vm50_vm0, %v2113_v35  ;;  %v895_v35 = vadd.f32 -1.1, %v890_v8 }
  0xc8   :  { %1478 = vmatprep.mubr.f32.mxu1 %v2151_v53  ;;  %1592 = vmatprep.mubr.msk.f32.mxu0 %vm50_vm0, %v2122_v38  ;;  %v894_v38 = vadd.f32 -1.1, %v889_v11  ;;  %v2268_v53 = vand.u32 2147483647, %v2260_v44 }
  0xc9   :  { %v906_v43 = vsub.f32 %v895_v35, %v901_v13 }
  0xca   :  { %v905_v45 = vsub.f32 %v894_v38, %v901_v13  ;;  %v919_v27 = vmul.f32 0.5, %v2268_v53 }
  0xcb   :  { %1479 = vmatmul.mubr.f32.gmra.mrb[2].mxu1 %v2154_v57  ;;  %1593 = vmatmul.mubr.msk.f32.gmra.mrb[2].mxu0 %vm50_vm0, %v2129_v42  ;;  %v2258_v42 = vmul.f32 14.142136, %v903_v31  ;;  %v2265_v28 = vmul.f32 14.142136, %v906_v43 }
  0xcc   :  { %v2270_v57 = vmul.f32 14.142136, %v905_v45  ;;  %v924_v59 = vadd.f32 1.0, %v919_v27 }
  0xcd   :  { %v2263_v23 = vand.u32 2147483647, %v2258_v42  ;;  %v2274_v19 = vand.u32 2147483647, %v2265_v28  ;;  %vm1073_vm5 = vcmp.ge.f32.partialorder %v2258_v42, 0.0  ;;  %vm1076_vm7 = vcmp.ge.f32.partialorder %v2265_v28, 0.0 }
  0xce   :  { %v2278_v30 = vand.u32 2147483647, %v2270_v57  ;;  %vm1075_vm8 = vcmp.ge.f32.partialorder %v2270_v57, 0.0 }
  0xcf   :  { %v918_v10 = vmul.f32 0.5, %v2263_v23  ;;  %v921_v0 = vmul.f32 0.5, %v2274_v19 }
  0xd0   :  { %v920_v60 = vmul.f32 0.5, %v2278_v30 }
  0xd1   :  { %v923_v63 = vadd.f32 1.0, %v918_v10  ;;  %v926_v36 = vadd.f32 1.0, %v921_v0 }
  0xd2   :  { %v925_v40 = vadd.f32 1.0, %v920_v60 }
  0xd3   :  { %1811 = vrcp.f32 %v923_v63 }
  0xd4   :  { %1813 = vrcp.f32 %v924_v59 }
  0xd5   :  { %1815 = vrcp.f32 %v926_v36 }
  0xd6   :  { %1817 = vrcp.f32 %v925_v40 }
  0xd7   :  { %1819 = vrcp.f32 %v927_v2 }
  0xdd   :  { %v1812_v3 = vpop.eup %1811 }
  0xde   :  { %v1814_v41 = vpop.eup %1813  ;;  %v933_v47 = vmul.f32 %v1812_v3, %v923_v63 }
  0xdf   :  { %v1816_v48 = vpop.eup %1815  ;;  %v934_v49 = vmul.f32 %v1814_v41, %v924_v59 }
  0xe0   :  { %v1818_v50 = vpop.eup %1817  ;;  %v938_v5 = vsub.f32 2.0, %v933_v47  ;;  %v936_v4 = vmul.f32 %v1816_v48, %v926_v36 }
  0xe1   :  { %v939_v6 = vsub.f32 2.0, %v934_v49  ;;  %v935_v9 = vmul.f32 %v1818_v50, %v925_v40  ;;  %v1820_v18 = vpop.eup %1819 }
  0xe2   :  { %v2288_v61 = vmul.f32 %v1812_v3, %v938_v5  ;;  %v941_v62 = vsub.f32 2.0, %v936_v4  ;;  %v937_v21 = vmul.f32 %v1820_v18, %v927_v2 }
  0xe3   :  { %v2290_v51 = vmul.f32 %v1814_v41, %v939_v6  ;;  %v940_v52 = vsub.f32 2.0, %v935_v9 }
  0xe4   :  { %v948_v22 = vmul.f32 0.17087276, %v2288_v61  ;;  %v2293_v54 = vmul.f32 %v1816_v48, %v941_v62  ;;  %v942_v15 = vsub.f32 2.0, %v937_v21 }
  0xe5   :  { %v949_v58 = vmul.f32 0.17087276, %v2290_v51  ;;  %v2296_v14 = vmul.f32 %v1818_v50, %v940_v52 }
  0xe6   :  { %v953_v25 = vadd.f32 -0.82215226, %v948_v22  ;;  %v951_v29 = vmul.f32 0.17087276, %v2293_v54  ;;  %v2300_v46 = vmul.f32 %v1820_v18, %v942_v15 }
  0xe7   :  { %v954_v33 = vadd.f32 -0.82215226, %v949_v58  ;;  %v950_v37 = vmul.f32 0.17087276, %v2296_v14 }
  0xe8   :  { %v958_v55 = vmul.f32 %v953_v25, %v2288_v61  ;;  %v956_v56 = vadd.f32 -0.82215226, %v951_v29  ;;  %v952_v12 = vmul.f32 0.17087276, %v2300_v46 }
  0xe9   :  { %v959_v7 = vmul.f32 %v954_v33, %v2290_v51  ;;  %v955_v8 = vadd.f32 -0.82215226, %v950_v37 }
  0xea   :  { %v963_v13 = vadd.f32 1.4885159, %v958_v55  ;;  %v961_v16 = vmul.f32 %v956_v56, %v2293_v54  ;;  %v957_v31 = vadd.f32 -0.82215226, %v952_v12 }
  0xeb   :  { %v964_v11 = vadd.f32 1.4885159, %v959_v7  ;;  %v960_v17 = vmul.f32 %v955_v8, %v2296_v14 }
  0xec   :  { %v968_v35 = vmul.f32 %v963_v13, %v2288_v61  ;;  %v966_v38 = vadd.f32 1.4885159, %v961_v16  ;;  %v962_v43 = vmul.f32 %v957_v31, %v2300_v46 }
  0xed   :  { %v969_v39 = vmul.f32 %v964_v11, %v2290_v51  ;;  %v965_v26 = vadd.f32 1.4885159, %v960_v17 }
  0xee   :  { %v973_v45 = vadd.f32 -1.135204, %v968_v35  ;;  %v971_v20 = vmul.f32 %v966_v38, %v2293_v54  ;;  %v967_v27 = vadd.f32 1.4885159, %v962_v43 }
  0xef   :  { %v974_v1 = vadd.f32 -1.135204, %v969_v39  ;;  %v970_v10 = vmul.f32 %v965_v26, %v2296_v14 }
  0xf0   :  { %v978_v63 = vmul.f32 %v973_v45, %v2288_v61  ;;  %v976_v0 = vadd.f32 -1.135204, %v971_v20  ;;  %v972_v36 = vmul.f32 %v967_v27, %v2300_v46 }
  0xf1   :  { %v979_v59 = vmul.f32 %v974_v1, %v2290_v51  ;;  %v975_v60 = vadd.f32 -1.135204, %v970_v10 }
  0xf2   :  { %v983_v40 = vadd.f32 0.27886808, %v978_v63  ;;  %v981_v24 = vmul.f32 %v976_v0, %v2293_v54  ;;  %v977_v41 = vadd.f32 -1.135204, %v972_v36 }
  0xf3   :  { %v984_v2 = vadd.f32 0.27886808, %v979_v59  ;;  %v980_v3 = vmul.f32 %v975_v60, %v2296_v14  ;;  %v1038_v59 = vsub.f32 0.0, %v2263_v23 }
  0xf4   :  { %v988_v47 = vmul.f32 %v983_v40, %v2288_v61  ;;  %v986_v48 = vadd.f32 0.27886808, %v981_v24  ;;  %v982_v5 = vmul.f32 %v977_v41, %v2300_v46  ;;  %v1039_v40 = vsub.f32 0.0, %v2268_v53 }
  0xf5   :  { %v989_v49 = vmul.f32 %v984_v2, %v2290_v51  ;;  %v985_v50 = vadd.f32 0.27886808, %v980_v3  ;;  %v1043_v41 = vmul.f32 %v1038_v59, %v2263_v23 }
  0xf6   :  { %v993_v4 = vadd.f32 -0.18628806, %v988_v47  ;;  %v991_v6 = vmul.f32 %v986_v48, %v2293_v54  ;;  %v987_v62 = vadd.f32 0.27886808, %v982_v5  ;;  %v1041_v48 = vsub.f32 0.0, %v2274_v19 }
  0xf7   :  { %v994_v9 = vadd.f32 -0.18628806, %v989_v49  ;;  %v990_v18 = vmul.f32 %v985_v50, %v2296_v14  ;;  %v1044_v50 = vmul.f32 %v1039_v40, %v2268_v53 }
  0xf8   :  { %v998_v52 = vmul.f32 %v993_v4, %v2288_v61  ;;  %v996_v21 = vadd.f32 -0.18628806, %v991_v6  ;;  %v992_v15 = vmul.f32 %v987_v62, %v2300_v46  ;;  %v1040_v4 = vsub.f32 0.0, %v2278_v30 }
  0xf9   :  { %v999_v22 = vmul.f32 %v994_v9, %v2290_v51  ;;  %v995_v58 = vadd.f32 -0.18628806, %v990_v18  ;;  %v1046_v62 = vmul.f32 %v1041_v48, %v2274_v19 }
  0xfa   :  { %v1003_v25 = vadd.f32 0.09678418, %v998_v52  ;;  %v1001_v29 = vmul.f32 %v996_v21, %v2293_v54  ;;  %v997_v55 = vadd.f32 -0.18628806, %v992_v15  ;;  %v1045_v23 = vmul.f32 %v1040_v4, %v2278_v30 }
  0xfb   :  { %v1004_v33 = vadd.f32 0.09678418, %v999_v22  ;;  %v1000_v37 = vmul.f32 %v995_v58, %v2296_v14  ;;  %v1042_v58 = vsub.f32 0.0, %v2285_v34 }
  0xfc   :  { %v1008_v56 = vmul.f32 %v1003_v25, %v2288_v61  ;;  %v1006_v7 = vadd.f32 0.09678418, %v1001_v29  ;;  %v1002_v13 = vmul.f32 %v997_v55, %v2300_v46 }
  0xfd   :  { %v1009_v8 = vmul.f32 %v1004_v33, %v2290_v51  ;;  %v1005_v12 = vadd.f32 0.09678418, %v1000_v37  ;;  %v1047_v37 = vmul.f32 %v1042_v58, %v2285_v34 }
  0xfe   :  { %v1013_v16 = vadd.f32 0.37409195, %v1008_v56  ;;  %v1011_v11 = vmul.f32 %v1006_v7, %v2293_v54  ;;  %v1007_v35 = vadd.f32 0.09678418, %v1002_v13 }
  0xff   :  { %v1014_v17 = vadd.f32 0.37409195, %v1009_v8  ;;  %v1010_v31 = vmul.f32 %v1005_v12, %v2296_v14 }
 0x100   :  { %v1018_v38 = vmul.f32 %v1013_v16, %v2288_v61  ;;  %v1016_v39 = vadd.f32 0.37409195, %v1011_v11  ;;  %v1012_v45 = vmul.f32 %v1007_v35, %v2300_v46 }
 0x101   :  { %v1019_v26 = vmul.f32 %v1014_v17, %v2290_v51  ;;  %v1015_v43 = vadd.f32 0.37409195, %v1010_v31 }
 0x102   :  { %v1023_v20 = vadd.f32 1.0000237, %v1018_v38  ;;  %v1021_v1 = vmul.f32 %v1016_v39, %v2293_v54  ;;  %v1017_v63 = vadd.f32 0.37409195, %v1012_v45 }
 0x103   :  { %v1024_v10 = vadd.f32 1.0000237, %v1019_v26  ;;  %v1020_v27 = vmul.f32 %v1015_v43, %v2296_v14 }
 0x104   :  { %v1028_v0 = vmul.f32 %v1023_v20, %v2288_v61  ;;  %v1026_v60 = vadd.f32 1.0000237, %v1021_v1  ;;  %v1022_v2 = vmul.f32 %v1017_v63, %v2300_v46 }
 0x105   :  { %v1029_v36 = vmul.f32 %v1024_v10, %v2290_v51  ;;  %v1025_v24 = vadd.f32 1.0000237, %v1020_v27 }
 0x106   :  { %v1033_v3 = vadd.f32 -1.2655122, %v1028_v0  ;;  %v1031_v47 = vmul.f32 %v1026_v60, %v2293_v54  ;;  %v1027_v6 = vadd.f32 1.0000237, %v1022_v2 }
 0x107   :  { %v1034_v49 = vadd.f32 -1.2655122, %v1029_v36  ;;  %v1030_v5 = vmul.f32 %v1025_v24, %v2296_v14 }
 0x108   :  { %v1048_v9 = vadd.f32 %v1043_v41, %v1033_v3  ;;  %v1036_v18 = vadd.f32 -1.2655122, %v1031_v47  ;;  %v1032_v22 = vmul.f32 %v1027_v6, %v2300_v46 }
 0x109   :  { %v1049_v52 = vadd.f32 %v1044_v50, %v1034_v49  ;;  %v1035_v21 = vadd.f32 -1.2655122, %v1030_v5 }
 0x10a   :  { %v1053_v15 = vmul.f32 1.442695, %v1048_v9  ;;  %v1051_v25 = vadd.f32 %v1046_v62, %v1036_v18  ;;  %v1037_v33 = vadd.f32 -1.2655122, %v1032_v22 }
 0x10b   :  { %v1055_v53 = vmul.f32 1.442695, %v1049_v52  ;;  %v1050_v29 = vadd.f32 %v1045_v23, %v1035_v21 }
 0x10c   :  { %1821 = vpow2.f32 %v1053_v15  ;;  %v1059_v55 = vmul.f32 1.442695, %v1051_v25  ;;  %v1052_v19 = vadd.f32 %v1047_v37, %v1037_v33 }
 0x10d   :  { %1823 = vpow2.f32 %v1055_v53  ;;  %v1057_v56 = vmul.f32 1.442695, %v1050_v29 }
 0x10e   :  { %1825 = vpow2.f32 %v1059_v55  ;;  %v1061_v7 = vmul.f32 1.442695, %v1052_v19 }
 0x10f   :  { %1827 = vpow2.f32 %v1057_v56 }
 0x110   :  { %1829 = vpow2.f32 %v1061_v7 }
 0x116   :  { %v1822_v30 = vpop.eup %1821 }
 0x117   :  { %v1824_v8 = vpop.eup %1823  ;;  %v1063_v13 = vmul.f32 %v1822_v30, %v2288_v61 }
 0x118   :  { %v1826_v12 = vpop.eup %1825  ;;  %v1064_v16 = vmul.f32 %v1824_v8, %v2290_v51 }
 0x119   :  { %v1828_v11 = vpop.eup %1827  ;;  %v1068_v17 = vsub.f32 1.0, %v1063_v13  ;;  %v1066_v34 = vmul.f32 %v1826_v12, %v2293_v54 }
 0x11a   :  { %v1069_v31 = vsub.f32 1.0, %v1064_v16  ;;  %v1065_v35 = vmul.f32 %v1828_v11, %v2296_v14  ;;  %v1830_v38 = vpop.eup %1829 }
 0x11b   :  { %v1078_v39 = vsub.f32 0.0, %v1068_v17  ;;  %v1071_v43 = vsub.f32 1.0, %v1066_v34  ;;  %v1067_v61 = vmul.f32 %v1830_v38, %v2300_v46 }
 0x11c   :  { %v1079_v26 = vsub.f32 0.0, %v1069_v31  ;;  %v1070_v45 = vsub.f32 1.0, %v1065_v35 }
 0x11d   :  { %v2360_v20 = vsel %vm1073_vm5, %v1068_v17, %v1078_v39  ;;  %v1081_v1 = vsub.f32 0.0, %v1071_v43  ;;  %v1072_v27 = vsub.f32 1.0, %v1067_v61 }
 0x11e   :  { %v1084_v51 = vsel %vm1074_vm6, %v1069_v31, %v1079_v26  ;;  %v1080_v10 = vsub.f32 0.0, %v1070_v45  ;;  %v1093_v54 = vrot.slane %v2360_v20, 7 }
 0x11f   :  { %v1094_v14 = vrot.slane %v1084_v51, 7  ;;  %v1086_v63 = vsel %vm1076_vm7, %v1071_v43, %v1081_v1  ;;  %v1082_v0 = vsub.f32 0.0, %v1072_v27 }
 0x120   :  { %v1085_v42 = vsel %vm1075_vm8, %v1070_v45, %v1080_v10  ;;  %v1098_v60 = vrot.slane %v1086_v63, 7  ;;  %v1105_v57 = vsub.f32 %v2360_v20, %v1093_v54 }
 0x121   :  { %v1095_v59 = vsel %vm1092_vm9, %v1093_v54, %v1094_v14  ;;  %v1096_v36 = vrot.slane %v1085_v42, 7  ;;  %v2368_v3 = vsel %vm1077_vm10, %v1072_v27, %v1082_v0 }
 0x122   :  { %v1106_v47 = vsub.f32 %v1084_v51, %v1095_v59  ;;  %v1109_v9 = vsub.f32 %v2368_v3, %v1098_v60 }
 0x123   :  { %v1097_v5 = vsel %vm1092_vm9, %v1094_v14, %v1096_v36  ;;  %v1099_v4 = vsel %vm1092_vm9, %v1096_v36, %v1098_v60 }
 0x124   :  { %v1107_v15 = vsub.f32 %v1085_v42, %v1097_v5  ;;  %v1108_v25 = vsub.f32 %v1086_v63, %v1099_v4 }
 0x19a   :  { %v1477_v44 = vpop.f32.mrb[0].mxu1  ;;  %v1591_v46 = vpop.f32.mrb[0].mxu0 }
 0x19b   :  { %v1787_v40 = vadd.f32 %v1591_v46, %v1477_v44  ;;  %v501_v24 = vpop.f32.mrb[1].mxu1  ;;  %v859_v28 = vpop.f32.mrb[1].mxu0 }
 0x19c   :  { %v1788_v2 = vadd.f32 %v859_v28, %v501_v24 }
 0x19d   :  { %v1152_v41 = vrot.slane %v1787_v40, 7 }
 0x19e   :  { %v1114_v48 = vmax.f32 %v1788_v2, %v1787_v40  ;;  %v1151_v49 = vrot.slane %v1788_v2, 7  ;;  %v1480_v50 = vpop.f32.mrb[2].mxu1  ;;  %v1594_v32 = vpop.f32.mrb[2].mxu0 }
 0x19f   :  { %v1789_v6 = vadd.f32 %v1594_v32, %v1480_v50  ;;  %v515_v18 = vpop.f32.mrb[3].mxu1  ;;  %v871_v62 = vpop.f32.mrb[3].mxu0  ;;  %v1110_v50 = vsub.f32 %v2368_v3, %v2360_v20 }
 0x1a0   :  { %v1153_v52 = vsel %vm1092_vm9, %v1151_v49, %v1152_v41  ;;  %v1163_v21 = vmul.f32 %v1151_v49, %v1105_v57  ;;  %v1790_v23 = vadd.f32 %v871_v62, %v515_v18 }
 0x1a1   :  { %v1164_v22 = vmul.f32 %v1153_v52, %v1106_v47  ;;  %v1156_v58 = vrot.slane %v1789_v6, 7  ;;  %v1111_v4 = vadd.f32 1e-06, %v1110_v50 }
 0x1a2   :  { %v1174_v53 = vrot.slane %v1163_v21, 1  ;;  %v1115_v29 = vmax.f32 %v1790_v23, %v1789_v6  ;;  %v1154_v33 = vrot.slane %v1790_v23, 7 }
 0x1a3   :  { %v1175_v37 = vrot.slane %v1164_v22, 1  ;;  %v1167_v55 = vmul.f32 %v1156_v58, %v1109_v9 }
 0x1a4   :  { %v1116_v56 = vmax.f32 %v1114_v48, %v1115_v29  ;;  %v1155_v19 = vsel %vm1092_vm9, %v1152_v41, %v1154_v33  ;;  %v1157_v7 = vsel %vm1092_vm9, %v1154_v33, %v1156_v58 }
 0x1a5   :  { %v1176_v30 = vsel %vm1173_vm11, %v1174_v53, %v1175_v37  ;;  %v1165_v8 = vmul.f32 %v1155_v19, %v1107_v15  ;;  %v1166_v12 = vmul.f32 %v1157_v7, %v1108_v25  ;;  %v1181_v16 = vrot.slane %v1167_v55, 1  ;;  %v2401_v25 = vld [vmem:[#allocation5_spill] sm:$0xff] }
 0x1a6   :  { %v1117_v13 = vrot.slane %v1116_v56, 4  ;;  %vm1202_vm12 = vcmp.lt.s32.totalorder %v2401_v25, 8 }
 0x1a7   :  { %v1177_v11 = vrot.slane %v1165_v8, 1  ;;  %v1179_v17 = vrot.slane %v1166_v12, 1 }
 0x1a8   :  { %v1118_v31 = vmax.f32 %v1116_v56, %v1117_v13 }
 0x1a9   :  { %v1178_v34 = vsel %vm1173_vm11, %v1175_v37, %v1177_v11  ;;  %v1180_v35 = vsel %vm1173_vm11, %v1177_v11, %v1179_v17  ;;  %v1182_v38 = vsel %vm1173_vm11, %v1179_v17, %v1181_v16 }
 0x1aa   :  { %v1119_v39 = vrot.slane %v1118_v31, 2  ;;  %v1187_v26 = vadd.f32 %v1178_v34, %v1176_v30 }
 0x1ac   :  { %v1120_v43 = vmax.f32 %v1118_v31, %v1119_v39  ;;  %v1188_v45 = vadd.f32 %v1187_v26, %v1180_v35 }
 0x1ae   :  { %v1121_v61 = vrot.slane %v1120_v43, 1  ;;  %v1189_v51 = vadd.f32 %v1188_v45, %v1182_v38 }
 0x1b0   :  { %v1122_v1 = vmax.f32 %v1120_v43, %v1121_v61  ;;  %v1190_v48 = vrot.slane %v1189_v51, 4 }
 0x1b2   :  { %v1123_v10 = vsub.f32 %v1788_v2, %v1122_v1  ;;  %v1124_v27 = vsub.f32 %v1787_v40, %v1122_v1  ;;  %v1125_v54 = vsub.f32 %v1790_v23, %v1122_v1  ;;  %v1126_v14 = vsub.f32 %v1789_v6, %v1122_v1 }
 0x1b3   :  { %v1191_v5 = vadd.f32 %v1190_v48, %v1189_v51 }
 0x1b4   :  { %v1127_v63 = vmul.f32 1.442695, %v1123_v10  ;;  %v1129_v42 = vmul.f32 1.442695, %v1124_v27  ;;  %v1131_v0 = vmul.f32 1.442695, %v1125_v54 }
 0x1b5   :  { %v1133_v44 = vmul.f32 1.442695, %v1126_v14  ;;  %v1192_v6 = vrot.slane %v1191_v5, 2 }
 0x1b6   :  { %1831 = vpow2.f32 %v1127_v63 }
 0x1b7   :  { %1833 = vpow2.f32 %v1129_v42  ;;  %v1193_v9 = vadd.f32 %v1192_v6, %v1191_v5 }
 0x1b8   :  { %1835 = vpow2.f32 %v1131_v0 }
 0x1b9   :  { %1837 = vpow2.f32 %v1133_v44  ;;  %v1194_v52 = vrot.slane %v1193_v9, 1 }
 0x1bb   :  { %v1195_v23 = vadd.f32 %v1194_v52, %v1193_v9 }
 0x1c0   :  { %v1832_v46 = vpop.eup %1831 }
 0x1c1   :  { %v1834_v59 = vpop.eup %1833 }
 0x1c2   :  { %v1135_v60 = vadd.f32 %v1834_v59, %v1832_v46  ;;  %v1836_v36 = vpop.eup %1835 }
 0x1c3   :  { %v1838_v28 = vpop.eup %1837 }
 0x1c4   :  { %v1136_v24 = vadd.f32 %v1836_v36, %v1135_v60 }
 0x1c6   :  { %v1137_v57 = vadd.f32 %v1838_v28, %v1136_v24 }
 0x1c8   :  { %v1138_v41 = vrot.slane %v1137_v57, 4 }
 0x1ca   :  { %v1139_v2 = vadd.f32 %v1138_v41, %v1137_v57 }
 0x1cc   :  { %v1140_v40 = vrot.slane %v1139_v2, 2 }
 0x1ce   :  { %v1141_v47 = vadd.f32 %v1140_v40, %v1139_v2 }
 0x1d0   :  { %v1142_v49 = vrot.slane %v1141_v47, 1 }
 0x1d2   :  { %v1143_v32 = vadd.f32 %v1142_v49, %v1141_v47 }
 0x1d4   :  { %1839 = vlog2.f32 %v1143_v32 }
 0x1d5   :  { %1841 = vrcp.f32 %v1111_v4 }
 0x1de   :  { %v1840_v18 = vpop.eup %1839 }
 0x1df   :  { %v1145_v62 = vmul.f32 0.6931472, %v1840_v18  ;;  %v1842_v58 = vpop.eup %1841 }
 0x1e1   :  { %v1146_v21 = vadd.f32 %v1145_v62, %v1122_v1 }
 0x1e3   :  { %v1196_v22 = vmul.f32 %v1146_v21, %v1110_v50 }
 0x1e5   :  { %v1197_v15 = vsub.f32 %v1196_v22, %v1195_v23 }
 0x1e7   :  { %v1198_v53 = vmul.f32 %v1842_v58, %v1197_v15 }
 0x1e9   :  { %v1203_v29 = vsel %vm1202_vm12, %v1198_v53, 0.0 }
 0x1ea   :  { %v1204_v20 = vsel %vm1092_vm9, %v1203_v29, 0.0 }
 0x1eb   :  { %1205 = vadd.xlane.f32.xlu0 %v1204_v20 }
 0x278   :  { %v1206_v3 = vpop.xlane.xlu0 %1205 }
 0x279   :  { %v1207_v33 = vrot.slane %v1206_v3, 4 }
 0x27b   :  { %v1208_v37 = vadd.f32 %v1207_v33, %v1206_v3 }
 0x27d   :  { %v1209_v55 = vrot.slane %v1208_v37, 2 }
 0x27f   :  { %v1210_v56 = vadd.f32 %v1209_v55, %v1208_v37 }
 0x281   :  { %v1211_v19 = vrot.slane %v1210_v56, 1 }
 0x283   :  { %v1212_v7 = vadd.f32 %v1211_v19, %v1210_v56 }
 0x285   :  { %1807 = vpush %v1212_v7 }
 0x2b6   :  { %s1808_s15 = spop %1807 }
 0x2b7   :  { %v1214_v30 = vstv %s1808_s15 }
 0x2b8   :  { %1215 = vst [vmem:[#allocation2] sm:$0xff] %v1214_v30 }
 0x2b9   :  { %1854 = shalt.err (!%p1851_p4)
}
 0x2ba   :  { %s1855_s19 = scalar_lea.hbm %s2398_s2, 128 }
 0x2bb   :  { %p1856_p5 = scmp.ne.s32.totalorder %s2398_s2, %s1855_s19  ;;  %p1859_p6 = scmp.lt.u32.totalorder %s1855_s19, %s2398_s2 }
 0x2bd   :  { %p1861_p7 = pnand %p1859_p6, %p1856_p5 }
 0x2bf   :  { %1864 = shalt.err (!%p1861_p7)
}
 0x2c0   :  { %1225 = dma.vmem_to_hbm [thread:$0]  %s1223_s14, 128, %s2398_s2, [#allocation3]  }
 0x2c1   :  { %1865 = dma.done.wait [#allocation3], 128  }
 0x2c2   :  { %1866 = vsyncadd [#allocation3], 4294967168 }
 0x2c3   :  { %1229 = vsyncpa [#allocation3], 1 }

</bundles_post_ra>
